<compile_context>
chip_gen: v5e
topology: v5e:2x2
jax: 0.10.0
libtpu: 0.0.40
codegen_flags: <defaults>
</compile_context>

<pallas_src>
import numpy as np
import jax
import jax.numpy as jnp
from jax import lax
from jax.experimental import pallas as pl
from jax.experimental.pallas import tpu as pltpu


def _mlp_kernel(x_ref, w1_ref, b1_ref, w2_ref, b2_ref, w3t_ref, b3_ref, o_ref):
    """One batch tile of the fused 3-layer regression MLP.

    x_ref   : (tile_b, E)  VMEM (f32 or bf16, cast in-kernel)
    w1_ref  : (E,  H1)     f32 VMEM    b1_ref : (1, H1)
    w2_ref  : (H1, H2)     f32 VMEM    b2_ref : (1, H2)
    w3t_ref : (1,  H2)     f32 VMEM    b3_ref : (1, 1)
    o_ref   : (1, tile_b)  f32 VMEM  (lane-dense output row)
    """
    x = x_ref[...].astype(jnp.float32)   # per-tile cast, hidden under the pipeline

    # Layer 1: Linear + ReLU (MXU, f32 accumulate)
    h = jnp.dot(x, w1_ref[...], preferred_element_type=jnp.float32) + b1_ref[...]
    h = jnp.maximum(h, 0.0)

    # Layer 2: Linear + ReLU
    h = jnp.dot(h, w2_ref[...], preferred_element_type=jnp.float32) + b2_ref[...]
    h = jnp.maximum(h, 0.0)

    # Layer 3 (scalar head), computed as (1,H2) . (tile_b,H2)^T -> (1, tile_b):
    # the batch lands on the lane dimension, so the store below is a dense,
    # unmasked row store instead of tile_b/8 width-1 masked stores.
    o = lax.dot_general(w3t_ref[...], h,
                        dimension_numbers=(((1,), (1,)), ((), ())),
                        preferred_element_type=jnp.float32)
    o = o + b3_ref[...]
    o_ref[...] = o.astype(o_ref.dtype)


def _choose_tile_b(B, tb_max):
    """Pick a batch tile: one full block for small B, otherwise large 128-row
    multiples with >= 4 (even) grid steps so both v7x TensorCores stay busy."""
    tb_max = max(128, (tb_max // 128) * 128)
    if B <= tb_max:
        return B                                  # block == full dim: always legal
    n_tiles = max(4, pl.cdiv(B, tb_max))
    n_tiles += n_tiles % 2                        # even split across 2 cores
    tile_b = pl.cdiv(B, n_tiles)
    tile_b = ((tile_b + 127) // 128) * 128        # lane/sublane friendly (f32 & bf16)
    return min(tile_b, tb_max)


def _reference_forward(x, params):
    """Plain-JAX reference mirroring the PyTorch forward exactly."""
    w1, b1, w2, b2, w3, b3 = params
    h = jnp.maximum(x @ w1 + b1, 0.0)
    h = jnp.maximum(h @ w2 + b2, 0.0)
    return (h @ w3 + b3).astype(jnp.float32)


def simple_regression_forward(x, params, *, tb=4096, use_pallas=None):
    """JAX/Pallas equivalent of CustomModelForSimpleRegression.forward(x).

    x      : (B, E) input embeddings (f32 or bf16)
    params : (w1, b1, w2, b2, w3, b3); weights in (in, out) layout (torch weight.T),
             biases as (1, out); w3 is (H2, 1), b3 is (1, 1).
    tb     : max batch-tile rows (~2048 for v5e, 4096-8192 for v6e/v7x).
    Returns: (B, 1) float32 regression output.
    """
    B, E = x.shape
    if use_pallas is None:
        use_pallas = B >= 1024        # tiny batches: XLA fuses the 3 GEMMs anyway
    if not use_pallas:
        return _reference_forward(x, params)

    w1, b1, w2, b2, w3, b3 = params
    H1 = w1.shape[1]
    H2 = w2.shape[1]
    w3t = jnp.reshape(w3, (1, H2))    # tiny (16-elem) reshape, free on the host side

    tile_b = _choose_tile_b(B, tb)
    n_tiles = pl.cdiv(B, tile_b)

    out = pl.pallas_call(
        _mlp_kernel,
        out_shape=jax.ShapeDtypeStruct((n_tiles, 1, tile_b), jnp.float32),
        grid_spec=pltpu.PrefetchScalarGridSpec(
            num_scalar_prefetch=0,
            grid=(n_tiles,),
            in_specs=[
                # streamed batch tile (double-buffered by Pallas)
                pl.BlockSpec((tile_b, E), lambda i: (i, 0)),
                # resident weights / biases (constant index_map -> fetched once)
                pl.BlockSpec((E, H1), lambda i: (0, 0)),
                pl.BlockSpec((1, H1), lambda i: (0, 0)),
                pl.BlockSpec((H1, H2), lambda i: (0, 0)),
                pl.BlockSpec((1, H2), lambda i: (0, 0)),
                pl.BlockSpec((1, H2), lambda i: (0, 0)),
                pl.BlockSpec((1, 1), lambda i: (0, 0)),
            ],
            # lane-dense (1, tile_b) row per grid step; leading tile axis squeezed
            out_specs=pl.BlockSpec((None, 1, tile_b), lambda i: (i, 0, 0)),
        ),
        compiler_params=pltpu.CompilerParams(
            dimension_semantics=("parallel",),
        ),
    )(x, w1, b1, w2, b2, w3t, b3)

    # (n_tiles, 1, tile_b) -> flat -> (B, 1); contiguous reshape, rows >= B dropped.
    return out.reshape(-1)[:B].reshape(B, 1)


if __name__ == "__main__":
    # Small shapes consistent with the module: input_embedding_size E,
    # hidden sizes int(2/3*E)=32 and int(1/3*E)=16, output size 1.
    B = 8
    E = 48
    H1 = int(2 / 3 * E)
    H2 = int(1 / 3 * E)

    key = jax.random.PRNGKey(0)
    ks = jax.random.split(key, 8)
    x = jax.random.normal(ks[0], (B, E), dtype=jnp.float32)
    w1 = jax.random.normal(ks[1], (E, H1), dtype=jnp.float32) / np.sqrt(E)
    b1 = jax.random.normal(ks[2], (1, H1), dtype=jnp.float32) * 0.1
    w2 = jax.random.normal(ks[3], (H1, H2), dtype=jnp.float32) / np.sqrt(H1)
    b2 = jax.random.normal(ks[4], (1, H2), dtype=jnp.float32) * 0.1
    w3 = jax.random.normal(ks[5], (H2, 1), dtype=jnp.float32) / np.sqrt(H2)
    b3 = jax.random.normal(ks[6], (1, 1), dtype=jnp.float32) * 0.1
    params = (w1, b1, w2, b2, w3, b3)

    # Single-tile path (force the Pallas kernel even at tiny B).
    out = simple_regression_forward(x, params, use_pallas=True)
    jax.block_until_ready(out)
    ref = _reference_forward(x, params)
    np.testing.assert_allclose(np.asarray(out), np.asarray(ref), rtol=1e-4, atol=1e-4)

    # Multi-tile path with a partial (clipped) last block — no wrapper pad.
    x2 = jax.random.normal(ks[7], (300, E), dtype=jnp.float32)
    out2 = simple_regression_forward(x2, params, tb=128, use_pallas=True)
    jax.block_until_ready(out2)
    ref2 = _reference_forward(x2, params)
    np.testing.assert_allclose(np.asarray(out2), np.asarray(ref2), rtol=1e-4, atol=1e-4)

    print("KERNEL_OK")
</pallas_src>

<mosaic_0001>
module attributes {stable_mosaic.version = 11 : i64} {
  func.func @_mlp_kernel(%arg0: i32, %arg1: memref<8x48xf32, #tpu.memory_space<vmem>>, %arg2: memref<48x32xf32, #tpu.memory_space<vmem>>, %arg3: memref<1x32xf32, #tpu.memory_space<vmem>>, %arg4: memref<32x16xf32, #tpu.memory_space<vmem>>, %arg5: memref<1x16xf32, #tpu.memory_space<vmem>>, %arg6: memref<1x16xf32, #tpu.memory_space<vmem>>, %arg7: memref<1x1xf32, #tpu.memory_space<vmem>>, %arg8: memref<1x1x8xf32, #tpu.memory_space<vmem>>) attributes {dimension_semantics = [#tpu.dimension_semantics<parallel>], iteration_bounds = array<i64: 1>, scalar_prefetch = 0 : i64, scratch_operands = 0 : i64, tpu.core_type = #tpu.core_type<tc>, window_params = [{transform_indices = @transform_0, window_bounds = array<i64: 8, 48>}, {pipeline_mode = #tpu.pipeline_mode<synchronous>, transform_indices = @transform_1, window_bounds = array<i64: 48, 32>}, {pipeline_mode = #tpu.pipeline_mode<synchronous>, transform_indices = @transform_2, window_bounds = array<i64: 1, 32>}, {pipeline_mode = #tpu.pipeline_mode<synchronous>, transform_indices = @transform_3, window_bounds = array<i64: 32, 16>}, {pipeline_mode = #tpu.pipeline_mode<synchronous>, transform_indices = @transform_4, window_bounds = array<i64: 1, 16>}, {pipeline_mode = #tpu.pipeline_mode<synchronous>, transform_indices = @transform_5, window_bounds = array<i64: 1, 16>}, {pipeline_mode = #tpu.pipeline_mode<synchronous>, transform_indices = @transform_6, window_bounds = array<i64: 1, 1>}, {transform_indices = @transform_7, window_bounds = array<i64: 1, 1, 8>}]} {
    %c0 = arith.constant 0 : index
    %c0_0 = arith.constant 0 : index
    %0 = vector.load %arg1[%c0, %c0_0] : memref<8x48xf32, #tpu.memory_space<vmem>>, vector<8x48xf32>
    %c0_1 = arith.constant 0 : index
    %c0_2 = arith.constant 0 : index
    %1 = vector.load %arg2[%c0_1, %c0_2] : memref<48x32xf32, #tpu.memory_space<vmem>>, vector<48x32xf32>
    %cst = arith.constant dense<0.000000e+00> : vector<8x32xf32>
    %2 = tpu.matmul %0, %1, %cst {dimension_numbers = #tpu.dot_dimension_numbers<[1], [0], [0], [1], [0, 0, 1, 1], [], []>} : vector<8x48xf32>, vector<48x32xf32>, vector<8x32xf32> -> vector<8x32xf32>
    %c0_3 = arith.constant 0 : index
    %c0_4 = arith.constant 0 : index
    %3 = vector.load %arg3[%c0_3, %c0_4] : memref<1x32xf32, #tpu.memory_space<vmem>>, vector<1x32xf32>
    %4 = vector.broadcast %3 : vector<1x32xf32> to vector<8x32xf32>
    %5 = arith.addf %2, %4 : vector<8x32xf32>
    %cst_5 = arith.constant 0.000000e+00 : f32
    %6 = vector.broadcast %cst_5 : f32 to vector<8x32xf32>
    %7 = arith.maximumf %5, %6 : vector<8x32xf32>
    %c0_6 = arith.constant 0 : index
    %c0_7 = arith.constant 0 : index
    %8 = vector.load %arg4[%c0_6, %c0_7] : memref<32x16xf32, #tpu.memory_space<vmem>>, vector<32x16xf32>
    %cst_8 = arith.constant dense<0.000000e+00> : vector<8x16xf32>
    %9 = tpu.matmul %7, %8, %cst_8 {dimension_numbers = #tpu.dot_dimension_numbers<[1], [0], [0], [1], [0, 0, 1, 1], [], []>} : vector<8x32xf32>, vector<32x16xf32>, vector<8x16xf32> -> vector<8x16xf32>
    %c0_9 = arith.constant 0 : index
    %c0_10 = arith.constant 0 : index
    %10 = vector.load %arg5[%c0_9, %c0_10] : memref<1x16xf32, #tpu.memory_space<vmem>>, vector<1x16xf32>
    %11 = vector.broadcast %10 : vector<1x16xf32> to vector<8x16xf32>
    %12 = arith.addf %9, %11 : vector<8x16xf32>
    %cst_11 = arith.constant 0.000000e+00 : f32
    %13 = vector.broadcast %cst_11 : f32 to vector<8x16xf32>
    %14 = arith.maximumf %12, %13 : vector<8x16xf32>
    %c0_12 = arith.constant 0 : index
    %c0_13 = arith.constant 0 : index
    %15 = vector.load %arg6[%c0_12, %c0_13] : memref<1x16xf32, #tpu.memory_space<vmem>>, vector<1x16xf32>
    %cst_14 = arith.constant dense<0.000000e+00> : vector<1x8xf32>
    %16 = tpu.matmul %15, %14, %cst_14 {dimension_numbers = #tpu.dot_dimension_numbers<[1], [1], [0], [0], [0, 0, 1, 0], [], []>} : vector<1x16xf32>, vector<8x16xf32>, vector<1x8xf32> -> vector<1x8xf32>
    %c0_15 = arith.constant 0 : index
    %c0_16 = arith.constant 0 : index
    %17 = vector.load %arg7[%c0_15, %c0_16] : memref<1x1xf32, #tpu.memory_space<vmem>>, vector<1x1xf32>
    %18 = vector.broadcast %17 : vector<1x1xf32> to vector<1x8xf32>
    %19 = arith.addf %16, %18 : vector<1x8xf32>
    %c0_17 = arith.constant 0 : index
    %c0_18 = arith.constant 0 : index
    %c0_19 = arith.constant 0 : index
    %20 = vector.load %arg8[%c0_17, %c0_18, %c0_19] : memref<1x1x8xf32, #tpu.memory_space<vmem>>, vector<1x1x8xf32>
    %21 = vector.shape_cast %20 : vector<1x1x8xf32> to vector<1x8xf32>
    %22 = vector.shape_cast %19 : vector<1x8xf32> to vector<1x1x8xf32>
    tpu.vector_store %arg8[%c0_17, %c0_18, %c0_19], %22 {strides = array<i32>} : memref<1x1x8xf32, #tpu.memory_space<vmem>>, vector<1x1x8xf32>,
    return
  }
  func.func @transform_0(%arg0: i32) -> (i32, i32) {
    %c0_i32 = arith.constant 0 : i32
    %c0_i32_0 = arith.constant 0 : i32
    return %arg0, %c0_i32 : i32, i32
  }
  func.func @transform_1(%arg0: i32) -> (i32, i32) {
    %c0_i32 = arith.constant 0 : i32
    %c0_i32_0 = arith.constant 0 : i32
    %c0_i32_1 = arith.constant 0 : i32
    return %c0_i32, %c0_i32_0 : i32, i32
  }
  func.func @transform_2(%arg0: i32) -> (i32, i32) {
    %c0_i32 = arith.constant 0 : i32
    %c0_i32_0 = arith.constant 0 : i32
    %c0_i32_1 = arith.constant 0 : i32
    return %c0_i32, %c0_i32_0 : i32, i32
  }
  func.func @transform_3(%arg0: i32) -> (i32, i32) {
    %c0_i32 = arith.constant 0 : i32
    %c0_i32_0 = arith.constant 0 : i32
    %c0_i32_1 = arith.constant 0 : i32
    return %c0_i32, %c0_i32_0 : i32, i32
  }
  func.func @transform_4(%arg0: i32) -> (i32, i32) {
    %c0_i32 = arith.constant 0 : i32
    %c0_i32_0 = arith.constant 0 : i32
    %c0_i32_1 = arith.constant 0 : i32
    return %c0_i32, %c0_i32_0 : i32, i32
  }
  func.func @transform_5(%arg0: i32) -> (i32, i32) {
    %c0_i32 = arith.constant 0 : i32
    %c0_i32_0 = arith.constant 0 : i32
    %c0_i32_1 = arith.constant 0 : i32
    return %c0_i32, %c0_i32_0 : i32, i32
  }
  func.func @transform_6(%arg0: i32) -> (i32, i32) {
    %c0_i32 = arith.constant 0 : i32
    %c0_i32_0 = arith.constant 0 : i32
    %c0_i32_1 = arith.constant 0 : i32
    return %c0_i32, %c0_i32_0 : i32, i32
  }
  func.func @transform_7(%arg0: i32) -> (i32, i32, i32) {
    %c0_i32 = arith.constant 0 : i32
    %c0_i32_0 = arith.constant 0 : i32
    %c0_i32_1 = arith.constant 0 : i32
    return %arg0, %c0_i32, %c0_i32_0 : i32, i32, i32
  }
}

</mosaic_0001>

<bundles_post_ra>
// kernel: tpu_custom_call.1
= control target key start
LH: loop header
LB: loop body
LE: loop exit
PB: predicated region body
PF: predicated region fallthrough
CT: control target
= control target key end

     0   :  { %s276_s0 = inlined_call_operand.vmem [shape: f32[8,48], index: 0, kind: input, shape index: {}]   ;;  %s277_s1 = inlined_call_operand.vmem [shape: f32[48,32], index: 1, kind: input, shape index: {}]   ;;  %s278_s2 = inlined_call_operand.vmem [shape: f32[1,32], index: 2, kind: input, shape index: {}]   ;;  %s279_s3 = inlined_call_operand.vmem [shape: f32[32,16], index: 3, kind: input, shape index: {}]   ;;  %s280_s4 = inlined_call_operand.vmem [shape: f32[1,16], index: 4, kind: input, shape index: {}]   ;;  %s281_s5 = inlined_call_operand.vmem [shape: f32[1,16], index: 5, kind: input, shape index: {}]   ;;  %s282_s6 = inlined_call_operand.<no memory space> [shape: f32[1,1], index: 6, kind: input, shape index: {}]   ;;  %s283_s7 = inlined_call_operand.hbm [shape: f32[1,1,8], index: 7, kind: output, shape index: {}]  }
   0x1   :  { %v12_v0 = vstv %s282_s6 }
   0x2   :  { %13 = vst [vmem:[#allocation2] sm:$0x1] %v12_v0 }
   0x3   :  { %v35_v1 = vld [vmem:[%s277_s1 + $0x28] sm:$0xff]  ;;  %v34_v2 = vld [vmem:[%s277_s1 + $0x20] sm:$0xff]  ;;  %v33_v3 = vld [vmem:[%s277_s1 + $0x18] sm:$0xff] }
   0x4   :  { %54 = vmatpush.msra.mxu0 %v35_v1  ;;  %v68_v4 = vld [vmem:[%s279_s3 + $0x18] sm:$0xff] }
   0x5   :  { %89 = vmatpush.msra.mxu1 %v68_v4 }
   0x6   :  { %55 = vmatpush.msra.mxu0 %v34_v2 }
   0x7   :  { %14 = vsyncpa [#allocation4], 0  ;;  %v32_v5 = vld [vmem:[%s277_s1 + $0x10] sm:$0xff]  ;;  %v31_v6 = vld [vmem:[%s277_s1 + $0x8] sm:$0xff]  ;;  %vm40_vm0 = vcmask 392192   ;;  %vm73_vm1 = vcmask 261120  }
   0x8   :  { %56 = vmatpush.msra.mxu0 %v33_v3  ;;  %v30_v7 = vld [vmem:[%s277_s1] sm:$0xff]  ;;  %v67_v9 = vld [vmem:[%s279_s3 + $0x10] sm:$0xff]  ;;  %v66_v10 = vld [vmem:[%s279_s3 + $0x8] sm:$0xff]  ;;  %v186_v17 = vmov 0   ;;  %vm106_vm2 = vcmask 130048   ;;  %s187_s26 = smov [#allocation3]  }
   0x9   :  { %v29_v8 = vld [vmem:[%s276_s0] sm:$0xff]  ;;  %90 = vmatpush.msra.mxu1 %v67_v9  ;;  %157 = vset.pattern.permute.xlu0 %v186_v17  ;;  %s140_s27 = sshll.u32 %s187_s26, 4  ;;  %s142_s30 = sshll.u32 %s283_s7, 4  ;;  %vm133_vm3 = vcmask 57344   ;;  %s141_s27 = int_to_ptr.vmem [resolvable:$true] %s140_s27  ;;  %s143_s30 = int_to_ptr.hbm [resolvable:$true] %s142_s30 }
   0xa   :  { %57 = vmatpush.msra.mxu0 %v32_v5  ;;  %v65_v11 = vld [vmem:[%s279_s3] sm:$0xff] }
   0xb   :  { %91 = vmatpush.msra.mxu1 %v66_v10  ;;  %v158_v12 = vld [vmem:[%s278_s2] ss:$0 sm:$0xff] }
   0xc   :  { %58 = vmatpush.msra.mxu0 %v31_v6  ;;  %v99_v16 = vld [vmem:[#allocation2] sm:$0x1] }
   0xd   :  { %92 = vmatpush.msra.mxu1 %v65_v11  ;;  %102 = vperm.xlu0 %157, %v99_v16   ;;  %v159_v18 = vld [vmem:[%s280_s4] ss:$0 sm:$0xff] }
   0xe   :  { %59 = vmatpush.msra.mxu0 %v30_v7  ;;  %v98_v22 = vld [vmem:[%s281_s5] sm:$0x1] }
   0xf   :  { %151 = vmatmul.msk.f32.vlgmr.msra.gmra.mxu0 %vm40_vm0, %v29_v8 }
  0x7f   :  { %v103_v23 = vpop.permute.xlu0 %102 }
  0x80   :  { %v105_v24 = vperm.slane %v103_v23, 0 }
  0x8c   :  { %v61_v13 = vpop.f32.mrf.mxu0 }
  0x8d   :  { %v62_v14 = vadd.f32 %v158_v12, %v61_v13 }
  0x8f   :  { %v64_v15 = vmax.f32 %v62_v14, 0.0 }
  0x91   :  { %152 = vmatmul.msk.f32.vlgmr.msra.gmra.mxu1 %vm73_vm1, %v64_v15 }
 0x10e   :  { %v94_v19 = vpop.f32.mrf.mxu1 }
 0x10f   :  { %v95_v20 = vadd.f32 %v159_v18, %v94_v19 }
 0x111   :  { %v97_v21 = vmax.f32 %v95_v20, 0.0 }
 0x113   :  { %153 = vmatpush.xpose.msk.msra.mxu2 %vm106_vm2, %v97_v21 }
 0x116   :  { %154 = vmatmul.msk.f32.vlgmr.msra.gmra.mxu2 %vm106_vm2, %v98_v22 }
 0x199   :  { %v130_v25 = vpop.f32.mrf.mxu2 }
 0x19a   :  { %v131_v26 = vadd.f32 %v130_v25, %v105_v24 }
 0x19c   :  { %134 = vst.msk [vmem:[#allocation3] sm:$0x1] %vm133_vm3, %v131_v26 }
 0x19d   :  { %145 = dma.vmem_to_hbm [thread:$0]  %s141_s27, 16, %s143_s30, [#allocation4]  }
 0x19e   :  { %184 = dma.done.wait [#allocation4], 16  }
 0x19f   :  { %185 = vsyncadd [#allocation4], 4294967280 }
 0x1a0   :  { %150 = vsyncpa [#allocation4], 1 }

</bundles_post_ra>
